<compile_context>
chip_gen: v7x
topology: tpu7x:2x2x1
jax: 0.10.0
libtpu: 0.0.40
codegen_flags: <defaults>
</compile_context>

<pallas_src>
import functools

import jax
import jax.numpy as jnp
from jax.experimental import pallas as pl
from jax.experimental.pallas import tpu as pltpu

# ---------------------------------------------------------------------------
# Tunables
# ---------------------------------------------------------------------------
_SUBLANE_MULT = 32              # tile_rows multiple valid for f32/bf16/int8 tiling
_TARGET_BLOCK_BYTES = 4 << 20   # ~4 MiB blocks amortize the ~0.35 us per-step cost
_MIN_BLOCK_BYTES = 1 << 20      # don't shrink below ~1 MiB just to lengthen the grid
_MIN_PALLAS_ELEMS = 256 * 1024  # below this, a fused XLA add beats a custom call


def _round_up(n, m):
    return ((n + m - 1) // m) * m


def _add_kernel(x_ref, y_ref, o_ref):
    # Promote on the VMEM tile (VPU work hidden under the DMA) and add.
    o_ref[...] = x_ref[...].astype(o_ref.dtype) + y_ref[...].astype(o_ref.dtype)


def _choose_cols(total):
    """Preferred lane-dense width (multiple of 128) that divides `total` exactly."""
    for cols in (512, 1024, 2048, 4096, 256, 128):
        if total % cols == 0:
            return cols
    return None


def _choose_tile_rows(rows, cols, itemsize):
    """Pick tile_rows: ~4 MiB blocks, grid >= 4 steps for megacore when possible."""
    row_bytes = cols * itemsize
    cap = max(_SUBLANE_MULT,
              (_TARGET_BLOCK_BYTES // row_bytes) // _SUBLANE_MULT * _SUBLANE_MULT)
    min_tile = max(_SUBLANE_MULT,
                   (_MIN_BLOCK_BYTES // row_bytes) // _SUBLANE_MULT * _SUBLANE_MULT)
    quarter = _round_up(pl.cdiv(rows, 4), _SUBLANE_MULT)
    tile = min(cap, max(quarter, min_tile))
    if tile >= rows:
        # Whole array fits one block (exempt from the (8,128) divisibility rule).
        return rows
    return tile


@functools.partial(
    jax.jit, static_argnames=("rows", "cols", "tile_rows", "out_dtype"))
def _pallas_shortcut_add(x, y, *, rows, cols, tile_rows, out_dtype):
    """x + y via a 1-D-grid Pallas streaming add over a lane-dense 2-D view."""
    # Contiguous row-major reshape under jit: a bitcast, no data movement.
    x2 = x.reshape(rows, cols)
    y2 = y.reshape(rows, cols)
    total = rows * cols
    bytes_accessed = total * (x.dtype.itemsize + y.dtype.itemsize
                              + jnp.dtype(out_dtype).itemsize)

    block = pl.BlockSpec((tile_rows, cols), lambda i: (i, 0))
    out2 = pl.pallas_call(
        _add_kernel,
        out_shape=jax.ShapeDtypeStruct((rows, cols), out_dtype),
        grid_spec=pl.GridSpec(
            # cdiv grid: the partial last block (if any) is masked by Pallas,
            # which is safe for this elementwise add — no padding / slicing.
            grid=(pl.cdiv(rows, tile_rows),),
            in_specs=[block, block],
            out_specs=block,
        ),
        compiler_params=pltpu.CompilerParams(
            # Embarrassingly parallel 1-D grid: shard across both TCs on v7x;
            # harmless no-op on single-TC v5e/v6e.
            dimension_semantics=("parallel",),
            # 3 arrays x 2 pipeline buffers x <=4 MiB blocks = <=24 MiB.
            # Explicit 32 MiB cap keeps headroom under v7x's 64 MiB physical
            # VMEM and overrides v5e's 16 MiB scoped default.
            vmem_limit_bytes=32 * 1024 * 1024,
        ),
        cost_estimate=pl.CostEstimate(
            flops=total, transcendentals=0, bytes_accessed=bytes_accessed),
    )(x2, y2)
    return out2.reshape(x.shape)


def shortcut(x, y=None, *, min_pallas_elems=_MIN_PALLAS_ELEMS):
    """Forward pass of ShortCut: return x if y is None else x + y."""
    if y is None:
        return x
    assert x.shape == y.shape, "ShortCut expects matching shapes"

    total = int(x.size)

    # Tiny / empty inputs: a plain XLA add (which can fuse with neighbouring
    # ops and needs no custom-call dispatch) beats the Pallas launch.
    if total == 0 or total < min_pallas_elems:
        return x + y

    cols = _choose_cols(total)
    if cols is None:
        # Rare: element count has no 128-multiple factorization.  Padding
        # would add full extra HBM passes (pad + slice) costing more than the
        # add itself, so let XLA handle it directly.
        return x + y

    out_dtype = jnp.result_type(x.dtype, y.dtype)
    rows = total // cols
    itemsize = max(jnp.dtype(x.dtype).itemsize,
                   jnp.dtype(y.dtype).itemsize,
                   jnp.dtype(out_dtype).itemsize)
    tile_rows = _choose_tile_rows(rows, cols, itemsize)

    return _pallas_shortcut_add(
        x, y, rows=rows, cols=cols, tile_rows=tile_rows, out_dtype=out_dtype)


if __name__ == "__main__":
    key = jax.random.PRNGKey(0)
    ks = jax.random.split(key, 4)

    # Spec-sized NCHW input (batch=2, channels=4, spatial=16x16).
    x = jax.random.normal(ks[0], (2, 4, 16, 16), dtype=jnp.float32)
    y = jax.random.normal(ks[1], (2, 4, 16, 16), dtype=jnp.float32)

    # Case 1: y is None -> identity (matches PyTorch).
    out_id = jax.block_until_ready(shortcut(x))
    assert jnp.array_equal(out_id, x)

    # Case 2: small input -> XLA fused-add fast path.
    out_small = jax.block_until_ready(shortcut(x, y))
    assert out_small.shape == x.shape and out_small.dtype == x.dtype
    assert jnp.allclose(out_small, x + y, atol=1e-6)

    # Case 3: same small input forced through the Pallas kernel
    # (single full-array block, no padding / slicing anywhere).
    out_forced = jax.block_until_ready(shortcut(x, y, min_pallas_elems=0))
    assert out_forced.shape == x.shape and out_forced.dtype == x.dtype
    assert jnp.allclose(out_forced, x + y, atol=1e-6)

    # Case 4: mixed dtypes -> promotion happens on the VMEM tile, in-kernel.
    y_bf16 = y.astype(jnp.bfloat16)
    out_mixed = jax.block_until_ready(shortcut(x, y_bf16, min_pallas_elems=0))
    assert out_mixed.dtype == jnp.result_type(x.dtype, y_bf16.dtype)
    assert jnp.allclose(out_mixed, x + y_bf16, atol=1e-2)

    # Case 5: larger feature map -> multi-block parallel grid with a masked
    # partial last block (rows=2080, tile_rows=544, grid=4).
    xb = jax.random.normal(ks[2], (5, 13, 128, 128), dtype=jnp.float32)
    yb = jax.random.normal(ks[3], (5, 13, 128, 128), dtype=jnp.float32)
    out_big = jax.block_until_ready(shortcut(xb, yb))
    assert out_big.shape == xb.shape and out_big.dtype == xb.dtype
    assert jnp.allclose(out_big, xb + yb, atol=1e-6)

    print("KERNEL_OK")
</pallas_src>

<mosaic_0001>
module attributes {stable_mosaic.version = 11 : i64} {
  func.func @_add_kernel(%arg0: i32, %arg1: memref<4x512xf32, #tpu.memory_space<vmem>>, %arg2: memref<4x512xf32, #tpu.memory_space<vmem>>, %arg3: memref<4x512xf32, #tpu.memory_space<vmem>>) attributes {dimension_semantics = [#tpu.dimension_semantics<parallel>], iteration_bounds = array<i64: 1>, scalar_prefetch = 0 : i64, scratch_operands = 0 : i64, tpu.core_type = #tpu.core_type<tc>, window_params = [{transform_indices = @transform_0, window_bounds = array<i64: 4, 512>}, {transform_indices = @transform_1, window_bounds = array<i64: 4, 512>}, {transform_indices = @transform_2, window_bounds = array<i64: 4, 512>}]} {
    %c0 = arith.constant 0 : index
    %c0_0 = arith.constant 0 : index
    %0 = vector.load %arg1[%c0, %c0_0] : memref<4x512xf32, #tpu.memory_space<vmem>>, vector<4x512xf32>
    %c0_1 = arith.constant 0 : index
    %c0_2 = arith.constant 0 : index
    %1 = vector.load %arg2[%c0_1, %c0_2] : memref<4x512xf32, #tpu.memory_space<vmem>>, vector<4x512xf32>
    %2 = arith.addf %0, %1 : vector<4x512xf32>
    %c0_3 = arith.constant 0 : index
    %c0_4 = arith.constant 0 : index
    %3 = vector.load %arg3[%c0_3, %c0_4] : memref<4x512xf32, #tpu.memory_space<vmem>>, vector<4x512xf32>
    tpu.vector_store %arg3[%c0_3, %c0_4], %2 {strides = array<i32>} : memref<4x512xf32, #tpu.memory_space<vmem>>, vector<4x512xf32>,
    return
  }
  func.func @transform_0(%arg0: i32) -> (i32, i32) {
    %c0_i32 = arith.constant 0 : i32
    %c0_i32_0 = arith.constant 0 : i32
    return %arg0, %c0_i32 : i32, i32
  }
  func.func @transform_1(%arg0: i32) -> (i32, i32) {
    %c0_i32 = arith.constant 0 : i32
    %c0_i32_0 = arith.constant 0 : i32
    return %arg0, %c0_i32 : i32, i32
  }
  func.func @transform_2(%arg0: i32) -> (i32, i32) {
    %c0_i32 = arith.constant 0 : i32
    %c0_i32_0 = arith.constant 0 : i32
    return %arg0, %c0_i32 : i32, i32
  }
}

</mosaic_0001>

<bundles_post_ra>
// kernel: _pallas_shortcut_add.1
= control target key start
LH: loop header
LB: loop body
LE: loop exit
PB: predicated region body
PF: predicated region fallthrough
CT: control target
= control target key end

     0   :  { %s56_s0 = inlined_call_operand.vmem [shape: f32[4,512], index: 0, kind: input, shape index: {}]   ;;  %s57_s1 = inlined_call_operand.vmem [shape: f32[4,512], index: 1, kind: input, shape index: {}]   ;;  %s58_s2 = inlined_call_operand.vmem [shape: f32[4,512], index: 2, kind: output, shape index: {}]  }
   0x1   :  { %v11_v0 = vld [vmem:[%s56_s0] sm:$0xff]  ;;  %v12_v2 = vld [vmem:[%s56_s0 + $0x8] sm:$0xff] }
   0x2   :  { %v13_v1 = vld [vmem:[%s57_s1] sm:$0xff]  ;;  %v14_v4 = vld [vmem:[%s57_s1 + $0x8] sm:$0xff] }
   0x3   :  { %v15_v3 = vadd.f32 %v13_v1, %v11_v0  ;;  %v16_v5 = vadd.f32 %v14_v4, %v12_v2 }
   0x5   :  { %17 = vst [vmem:[%s58_s2] sm:$0xff] %v15_v3  ;;  %18 = vst [vmem:[%s58_s2 + $0x8] sm:$0xff] %v16_v5 }

</bundles_post_ra>
